<compile_context>
chip_gen: v5e
topology: v5e:2x2
jax: 0.10.0
libtpu: 0.0.40
codegen_flags: <defaults>
</compile_context>

<pallas_src>
import functools

import jax
import jax.numpy as jnp
from jax.experimental import pallas as pl
from jax.experimental.pallas import tpu as pltpu


# ----------------------------- helpers -------------------------------------


def _round_up(x, m):
    return ((x + m - 1) // m) * m


# ----------------------------- kernels -------------------------------------


def _linear_block_eval_kernel(x_ref, w_ref, b_ref, o_ref, acc_ref):
    k = pl.program_id(2)

    @pl.when(k == 0)
    def _():
        acc_ref[...] = jnp.zeros_like(acc_ref)

    acc_ref[...] += jnp.dot(
        x_ref[...], w_ref[...], preferred_element_type=jnp.float32
    )

    @pl.when(k == pl.num_programs(2) - 1)
    def _():
        y = acc_ref[...] + b_ref[...]          # (1, tn) broadcasts over (tb, tn)
        o_ref[...] = jnp.maximum(y, 0.0).astype(o_ref.dtype)


def _linear_block_train_kernel(
    x_ref, w_ref, b_ref, rnd_ref, o_ref, acc_ref, *, keep_threshold, inv_keep_prob
):
    k = pl.program_id(2)

    @pl.when(k == 0)
    def _():
        acc_ref[...] = jnp.zeros_like(acc_ref)

    acc_ref[...] += jnp.dot(
        x_ref[...], w_ref[...], preferred_element_type=jnp.float32
    )

    @pl.when(k == pl.num_programs(2) - 1)
    def _():
        y = acc_ref[...] + b_ref[...]
        y = jnp.maximum(y, 0.0)
        # Integer threshold compare (no int->f32 convert in the epilogue):
        # rnd is uniform in [0, 2^24); drop iff rnd < p * 2^24.
        keep = rnd_ref[...] >= keep_threshold
        o_ref[...] = (jnp.where(keep, y, 0.0) * inv_keep_prob).astype(o_ref.dtype)


# ----------------------------- wrapper --------------------------------------


def linear_block(
    x,
    weight_t,
    bias,
    *,
    p=0.2,
    training=False,
    seed=0,
    tile_b=256,
    tile_n=256,
    tile_k=512,
    compute_dtype=jnp.float32,
):
    """Pallas implementation of LinearBlock.forward.

    x:        [B, in_dim] float32
    weight_t: [in_dim, out_dim] float32   (PyTorch weight transposed)
    bias:     [out_dim] float32
    compute_dtype: dtype of the matmul inputs (bf16 recommended on v6e/v7x);
                   accumulation is always float32.
    """
    B, K = x.shape
    K2, N = weight_t.shape
    assert K == K2 and bias.shape == (N,)

    # Tile sizes: MXU-shaped when the dims are large, full-dim when small.
    tb = _round_up(B, 8) if B <= tile_b else tile_b
    tn = _round_up(N, 128) if N <= tile_n else tile_n      # lane-dense output
    tk = _round_up(K, 8) if K <= tile_k else tile_k
    Bp, Np, Kp = _round_up(B, tb), _round_up(N, tn), _round_up(K, tk)

    xp = x.astype(compute_dtype)
    wp = weight_t.astype(compute_dtype)
    if (Bp, Kp) != (B, K):
        xp = jnp.pad(xp, ((0, Bp - B), (0, Kp - K)))
    if (Kp, Np) != (K, N):
        wp = jnp.pad(wp, ((0, Kp - K), (0, Np - N)))
    bp = bias.astype(jnp.float32)
    if Np != N:
        bp = jnp.pad(bp, (0, Np - N))
    bp = bp.reshape(1, Np)

    grid = (Bp // tb, Np // tn, Kp // tk)
    x_spec = pl.BlockSpec((tb, tk), lambda i, j, k: (i, k))
    w_spec = pl.BlockSpec((tk, tn), lambda i, j, k: (k, j))
    b_spec = pl.BlockSpec((1, tn), lambda i, j, k: (0, j))
    o_spec = pl.BlockSpec((tb, tn), lambda i, j, k: (i, j))
    out_shape = jax.ShapeDtypeStruct((Bp, Np), jnp.float32)

    itemsize = jnp.dtype(compute_dtype).itemsize
    cost = pl.CostEstimate(
        flops=2 * Bp * Kp * Np,
        transcendentals=0,
        bytes_accessed=itemsize * (Bp * Kp + Kp * Np) + 4 * (Bp * Np + Np),
    )
    cparams = pltpu.CompilerParams(
        dimension_semantics=("parallel", "parallel", "arbitrary"),
    )
    scratch = [pltpu.VMEM((tb, tn), jnp.float32)]

    if not training:
        out = pl.pallas_call(
            _linear_block_eval_kernel,
            out_shape=out_shape,
            grid_spec=pltpu.PrefetchScalarGridSpec(
                num_scalar_prefetch=0,
                grid=grid,
                in_specs=[x_spec, w_spec, b_spec],
                out_specs=o_spec,
                scratch_shapes=scratch,
            ),
            compiler_params=cparams,
            cost_estimate=cost,
        )(xp, wp, bp)
    else:
        # Host-side randomness (see TODO at top); uniform ints in [0, 2^24).
        rnd = jax.random.randint(
            jax.random.PRNGKey(seed), (Bp, Np), 0, 1 << 24, dtype=jnp.int32
        )
        keep_threshold = int(round(float(p) * (1 << 24)))
        rnd_spec = pl.BlockSpec((tb, tn), lambda i, j, k: (i, j))
        out = pl.pallas_call(
            functools.partial(
                _linear_block_train_kernel,
                keep_threshold=keep_threshold,
                inv_keep_prob=float(1.0 / (1.0 - float(p))),
            ),
            out_shape=out_shape,
            grid_spec=pltpu.PrefetchScalarGridSpec(
                num_scalar_prefetch=0,
                grid=grid,
                in_specs=[x_spec, w_spec, b_spec, rnd_spec],
                out_specs=o_spec,
                scratch_shapes=scratch,
            ),
            compiler_params=cparams,
            cost_estimate=cost,
        )(xp, wp, bp, rnd)

    if (Bp, Np) != (B, N):
        out = out[:B, :N]
    return out


# ----------------------------- main -----------------------------------------


if __name__ == "__main__":
    B, IN_DIM, OUT_DIM = 16, 32, 128

    key = jax.random.PRNGKey(0)
    kx, kw, kb = jax.random.split(key, 3)

    x = jax.random.normal(kx, (B, IN_DIM), dtype=jnp.float32)
    # Deterministic "Linear" params (PyTorch stores weight as [out, in]);
    # we keep the transposed [in, out] layout for the kernel.
    bound = 1.0 / (IN_DIM ** 0.5)
    weight_t = jax.random.uniform(
        kw, (IN_DIM, OUT_DIM), minval=-bound, maxval=bound, dtype=jnp.float32
    )
    bias = jax.random.uniform(
        kb, (OUT_DIM,), minval=-bound, maxval=bound, dtype=jnp.float32
    )

    ref = jnp.maximum(x @ weight_t + bias, 0.0)

    # Eval mode (dropout = identity), f32 matmul: tight check vs JAX reference.
    out_eval = jax.block_until_ready(linear_block(x, weight_t, bias, training=False))
    assert out_eval.shape == (B, OUT_DIM)
    assert jnp.allclose(out_eval, ref, atol=1e-5, rtol=1e-5)

    # Eval mode with bf16 matmul inputs + f32 accumulation (v6e/v7x fast path).
    out_bf16 = jax.block_until_ready(
        linear_block(x, weight_t, bias, training=False, compute_dtype=jnp.bfloat16)
    )
    assert jnp.allclose(out_bf16, ref, atol=5e-2, rtol=5e-2)

    # Training mode: each output is either dropped (0) or relu(xW+b) / (1-p).
    out_train = jax.block_until_ready(
        linear_block(x, weight_t, bias, training=True, seed=123)
    )
    assert out_train.shape == (B, OUT_DIM)
    scaled = ref / 0.8
    ok = jnp.isclose(out_train, 0.0, atol=1e-6) | jnp.isclose(
        out_train, scaled, atol=1e-4, rtol=1e-4
    )
    assert bool(jnp.all(ok))
    # Loose statistical check that roughly 80% of positive activations survive.
    keep_frac = jnp.mean((out_train > 0).astype(jnp.float32)[ref > 0])
    assert 0.6 < float(keep_frac) < 0.95

    print("KERNEL_OK")
</pallas_src>

<mosaic_0001>
module attributes {stable_mosaic.version = 11 : i64} {
  func.func @_linear_block_eval_kernel(%arg0: i32, %arg1: i32, %arg2: i32, %arg3: memref<16x32xf32, #tpu.memory_space<vmem>>, %arg4: memref<32x128xf32, #tpu.memory_space<vmem>>, %arg5: memref<1x128xf32, #tpu.memory_space<vmem>>, %arg6: memref<16x128xf32, #tpu.memory_space<vmem>>, %arg7: memref<16x128xf32, #tpu.memory_space<vmem>>) attributes {dimension_semantics = [#tpu.dimension_semantics<parallel>, #tpu.dimension_semantics<parallel>, #tpu.dimension_semantics<arbitrary>], iteration_bounds = array<i64: 1, 1, 1>, scalar_prefetch = 0 : i64, scratch_operands = 1 : i64, tpu.core_type = #tpu.core_type<tc>, window_params = [{transform_indices = @transform_0, window_bounds = array<i64: 16, 32>}, {transform_indices = @transform_1, window_bounds = array<i64: 32, 128>}, {transform_indices = @transform_2, window_bounds = array<i64: 1, 128>}, {transform_indices = @transform_3, window_bounds = array<i64: 16, 128>}]} {
    %c0_i32 = arith.constant 0 : i32
    %0 = arith.cmpi eq, %arg2, %c0_i32 : i32
    %1 = arith.extui %0 : i1 to i32
    %c0_i32_0 = arith.constant 0 : i32
    %2 = arith.cmpi ne, %1, %c0_i32_0 : i32
    scf.if %2 {
      %cst_10 = arith.constant 0.000000e+00 : f32
      %12 = vector.broadcast %cst_10 : f32 to vector<16x128xf32>
      %c0_11 = arith.constant 0 : index
      %c0_12 = arith.constant 0 : index
      %13 = vector.load %arg7[%c0_11, %c0_12] : memref<16x128xf32, #tpu.memory_space<vmem>>, vector<16x128xf32>
      tpu.vector_store %arg7[%c0_11, %c0_12], %12 {strides = array<i32>} : memref<16x128xf32, #tpu.memory_space<vmem>>, vector<16x128xf32>,
    } else {
    }
    %c0 = arith.constant 0 : index
    %c0_1 = arith.constant 0 : index
    %3 = vector.load %arg7[%c0, %c0_1] : memref<16x128xf32, #tpu.memory_space<vmem>>, vector<16x128xf32>
    %c0_2 = arith.constant 0 : index
    %c0_3 = arith.constant 0 : index
    %4 = vector.load %arg3[%c0_2, %c0_3] : memref<16x32xf32, #tpu.memory_space<vmem>>, vector<16x32xf32>
    %c0_4 = arith.constant 0 : index
    %c0_5 = arith.constant 0 : index
    %5 = vector.load %arg4[%c0_4, %c0_5] : memref<32x128xf32, #tpu.memory_space<vmem>>, vector<32x128xf32>
    %cst = arith.constant dense<0.000000e+00> : vector<16x128xf32>
    %6 = tpu.matmul %4, %5, %cst {dimension_numbers = #tpu.dot_dimension_numbers<[1], [0], [0], [1], [0, 0, 1, 1], [], []>} : vector<16x32xf32>, vector<32x128xf32>, vector<16x128xf32> -> vector<16x128xf32>
    %7 = arith.addf %3, %6 : vector<16x128xf32>
    %c0_6 = arith.constant 0 : index
    %c0_7 = arith.constant 0 : index
    %8 = vector.load %arg7[%c0_6, %c0_7] : memref<16x128xf32, #tpu.memory_space<vmem>>, vector<16x128xf32>
    tpu.vector_store %arg7[%c0_6, %c0_7], %7 {strides = array<i32>} : memref<16x128xf32, #tpu.memory_space<vmem>>, vector<16x128xf32>,
    %c0_i32_8 = arith.constant 0 : i32
    %9 = arith.cmpi eq, %arg2, %c0_i32_8 : i32
    %10 = arith.extui %9 : i1 to i32
    %c0_i32_9 = arith.constant 0 : i32
    %11 = arith.cmpi ne, %10, %c0_i32_9 : i32
    scf.if %11 {
      %c0_10 = arith.constant 0 : index
      %c0_11 = arith.constant 0 : index
      %12 = vector.load %arg7[%c0_10, %c0_11] : memref<16x128xf32, #tpu.memory_space<vmem>>, vector<16x128xf32>
      %c0_12 = arith.constant 0 : index
      %c0_13 = arith.constant 0 : index
      %13 = vector.load %arg5[%c0_12, %c0_13] : memref<1x128xf32, #tpu.memory_space<vmem>>, vector<1x128xf32>
      %14 = vector.broadcast %13 : vector<1x128xf32> to vector<16x128xf32>
      %15 = arith.addf %12, %14 : vector<16x128xf32>
      %cst_14 = arith.constant 0.000000e+00 : f32
      %16 = vector.broadcast %cst_14 : f32 to vector<16x128xf32>
      %17 = arith.maximumf %15, %16 : vector<16x128xf32>
      %c0_15 = arith.constant 0 : index
      %c0_16 = arith.constant 0 : index
      %18 = vector.load %arg6[%c0_15, %c0_16] : memref<16x128xf32, #tpu.memory_space<vmem>>, vector<16x128xf32>
      tpu.vector_store %arg6[%c0_15, %c0_16], %17 {strides = array<i32>} : memref<16x128xf32, #tpu.memory_space<vmem>>, vector<16x128xf32>,
    } else {
    }
    return
  }
  func.func @transform_0(%arg0: i32, %arg1: i32, %arg2: i32) -> (i32, i32) {
    %c0_i32 = arith.constant 0 : i32
    return %arg0, %arg2 : i32, i32
  }
  func.func @transform_1(%arg0: i32, %arg1: i32, %arg2: i32) -> (i32, i32) {
    %c0_i32 = arith.constant 0 : i32
    return %arg2, %arg1 : i32, i32
  }
  func.func @transform_2(%arg0: i32, %arg1: i32, %arg2: i32) -> (i32, i32) {
    %c0_i32 = arith.constant 0 : i32
    %c0_i32_0 = arith.constant 0 : i32
    return %c0_i32, %arg1 : i32, i32
  }
  func.func @transform_3(%arg0: i32, %arg1: i32, %arg2: i32) -> (i32, i32) {
    %c0_i32 = arith.constant 0 : i32
    return %arg0, %arg1 : i32, i32
  }
}

</mosaic_0001>

<bundles_post_ra>
// kernel: tpu_custom_call.1
= control target key start
LH: loop header
LB: loop body
LE: loop exit
PB: predicated region body
PF: predicated region fallthrough
CT: control target
= control target key end

     0   :  { %8 = vsyncpa [#allocation4], 0  ;;  %s266_s0 = inlined_call_operand.hbm [shape: f32[16,32], index: 0, kind: input, shape index: {}]   ;;  %s267_s1 = inlined_call_operand.hbm [shape: f32[32,128], index: 1, kind: input, shape index: {}]   ;;  %s268_s2 = inlined_call_operand.vmem [shape: f32[1,128], index: 2, kind: input, shape index: {}]   ;;  %s269_s3 = inlined_call_operand.hbm [shape: f32[16,128], index: 3, kind: output, shape index: {}]  }
   0x1   :  { %9 = vsyncpa [#allocation7], 0 }
   0x2   :  { %10 = vsyncpa [#allocation5], 0  ;;  %s15_s14 = sshll.u32 %s266_s0, 4  ;;  %s220_s15 = smov [#allocation3]   ;;  %s16_s14 = int_to_ptr.hbm [resolvable:$true] %s15_s14 }
   0x3   :  { %s17_s16 = sshll.u32 %s220_s15, 4  ;;  %s28_s19 = sshll.u32 %s267_s1, 4  ;;  %s18_s16 = int_to_ptr.vmem [resolvable:$true] %s17_s16  ;;  %s29_s19 = int_to_ptr.hbm [resolvable:$true] %s28_s19 }
   0x4   :  { %s221_s20 = smov 128   ;;  %s222_s21 = smov 8  }
   0x5   :  { %23 = dma.hbm_to_vmem [thread:$0]  %s16_s14, 256, %s18_s16, [#allocation4], %s221_s20, %s221_s20, %s222_s21  }
   0x6   :  { %s223_s22 = smov [#allocation6]  }
   0x7   :  { %s30_s23 = sshll.u32 %s223_s22, 4  ;;  %s31_s23 = int_to_ptr.vmem [resolvable:$true] %s30_s23 }
   0x8   :  { %36 = dma.hbm_to_vmem [thread:$0]  %s29_s19, 512, %s31_s23, [#allocation7], %s221_s20, %s221_s20, %s222_s21  }
   0x9   :  { %214 = dma.done.wait [#allocation4], 256  }
   0xa   :  { %215 = vsyncadd [#allocation4], 4294967040 }
   0xb   :  { %216 = dma.done.wait [#allocation7], 512  }
   0xc   :  { %217 = vsyncadd [#allocation7], 4294966784  ;;  %v60_v0 = vld [vmem:[#allocation6 + $0x18] sm:$0xff]  ;;  %v59_v1 = vld [vmem:[#allocation6 + $0x10] sm:$0xff]  ;;  %vm61_vm0 = vcmask 261120   ;;  %s224_s24 = smov [#allocation8]  }
   0xd   :  { %80 = vmatpush.msra.mxu0 %v60_v0  ;;  %132 = vmatpush.msra.mxu1 %v60_v0  ;;  %v58_v2 = vld [vmem:[#allocation6 + $0x8] sm:$0xff]  ;;  %v57_v3 = vld [vmem:[#allocation6] sm:$0xff]  ;;  %v55_v4 = vld [vmem:[#allocation3] sm:$0xff]  ;;  %s114_s25 = sshll.u32 %s224_s24, 4  ;;  %s116_s28 = sshll.u32 %s269_s3, 4  ;;  %s115_s25 = int_to_ptr.vmem [resolvable:$true] %s114_s25  ;;  %s117_s28 = int_to_ptr.hbm [resolvable:$true] %s116_s28 }
   0xe   :  { %v56_v5 = vld [vmem:[#allocation3 + $0x8] sm:$0xff]  ;;  %v141_v6 = vld [vmem:[%s268_s2] ss:$0 sm:$0xff] }
   0xf   :  { %81 = vmatpush.msra.mxu0 %v59_v1  ;;  %133 = vmatpush.msra.mxu1 %v59_v1 }
  0x11   :  { %82 = vmatpush.msra.mxu0 %v58_v2  ;;  %134 = vmatpush.msra.mxu1 %v58_v2 }
  0x13   :  { %83 = vmatpush.msra.mxu0 %v57_v3  ;;  %135 = vmatpush.msra.mxu1 %v57_v3 }
  0x14   :  { %130 = vmatmul.msk.f32.vlgmr.msra.gmra.mxu0 %vm61_vm0, %v55_v4  ;;  %131 = vmatmul.msk.f32.vlgmr.msra.gmra.mxu1 %vm61_vm0, %v56_v5 }
  0x91   :  { %v85_v7 = vpop.f32.mrf.mxu0  ;;  %v88_v8 = vpop.f32.mrf.mxu1 }
  0x92   :  { %v104_v9 = vadd.f32 %v141_v6, %v85_v7  ;;  %v105_v10 = vadd.f32 %v141_v6, %v88_v8 }
  0x94   :  { %v106_v11 = vmax.f32 %v104_v9, 0.0  ;;  %v107_v12 = vmax.f32 %v105_v10, 0.0 }
  0x96   :  { %108 = vst [vmem:[#allocation8] sm:$0xff] %v106_v11 }
  0x97   :  { %109 = vst [vmem:[#allocation8 + $0x8] sm:$0xff] %v107_v12 }
  0x98   :  { %122 = dma.vmem_to_hbm [thread:$0]  %s115_s25, 256, %s117_s28, [#allocation5], %s221_s20, %s221_s20, %s222_s21  }
  0x99   :  { %218 = dma.done.wait [#allocation5], 256  }
  0x9a   :  { %219 = vsyncadd [#allocation5], 4294967040 }
  0x9b   :  { %127 = vsyncpa [#allocation4], 1 }
  0x9c   :  { %128 = vsyncpa [#allocation7], 1 }
  0x9d   :  { %129 = vsyncpa [#allocation5], 1 }

</bundles_post_ra>
